<compile_context>
chip_gen: v7x
topology: tpu7x:2x2x1
jax: 0.10.0
libtpu: 0.0.40
codegen_flags: <defaults>
</compile_context>

<pallas_src>
import jax
import jax.numpy as jnp
from jax.experimental import pallas as pl
from jax.experimental.pallas import tpu as pltpu


def _spatial_attention_kernel(params_ref, x_ref, o_ref):
    # params_ref: SMEM (3,) f32 -> [w_avg / C, w_max, bias]
    # x_ref / o_ref: VMEM (NB, C, TL) tiles in the input dtype.
    x = x_ref[...]                                                  # (NB, C, TL)
    s = jnp.sum(x, axis=1, keepdims=True, dtype=jnp.float32)        # f32 channel sum
    mx = jnp.max(x, axis=1, keepdims=True).astype(jnp.float32)      # f32 channel max
    logits = params_ref[0] * s + params_ref[1] * mx + params_ref[2]
    attn = jax.nn.sigmoid(logits)                                   # (NB, 1, TL) f32
    o_ref[...] = x * attn.astype(x.dtype)                           # broadcast over C


def _round_up(a, b):
    return ((a + b - 1) // b) * b


def _cdiv(a, b):
    return (a + b - 1) // b


_BLOCK_BUDGET = 4 << 20  # target VMEM footprint per (nb, c_pad, tl) block


def spatial_attention(x, conv_w, conv_b):
    """x: (N, C, L); conv_w: (1, 2, 1); conv_b: (1,). Returns (N, C, L) in x.dtype."""
    n, c, l = x.shape
    itemsize = jnp.dtype(x.dtype).itemsize
    # Sublane padding granularity: 8 rows of 32-bit; sub-32-bit packs along sublanes.
    sublane = 8 * max(1, 4 // itemsize)
    c_pad = _round_up(c, sublane)

    # Fold the 1/C of the channel mean into the conv weight: logits = w0*sum + w1*max + b.
    w = conv_w.reshape(2).astype(jnp.float32)
    params = jnp.stack([w[0] / c, w[1], conv_b.reshape(()).astype(jnp.float32)])

    # ---- tile selection ---------------------------------------------------
    l128 = _round_up(l, 128)
    tl_cap = max(128, (_BLOCK_BUDGET // (c_pad * itemsize)) // 128 * 128)
    tl = min(l128, tl_cap)                                   # multiple of 128
    nb = max(1, min(n, _BLOCK_BUDGET // (c_pad * tl * itemsize)))

    # Keep enough grid steps for DMA/compute overlap and both v7x TensorCores
    # when the problem is big enough to care; shrink TL first, then NB.
    total_bytes = n * c_pad * l128 * itemsize
    if total_bytes >= (32 << 20):
        min_steps = 8
    elif total_bytes >= (8 << 20):
        min_steps = 4
    elif total_bytes >= (2 << 20):
        min_steps = 2
    else:
        min_steps = 1
    while _cdiv(n, nb) * _cdiv(l, tl) < min_steps:
        if tl > 128:
            tl = max(128, _round_up(tl // 2, 128))
        elif nb > 1:
            nb = _cdiv(nb, 2)
        else:
            break

    grid = (_cdiv(n, nb), _cdiv(l, tl))

    # VMEM budget: in+out double-buffered (4x block) + f32 reduce temp + headroom.
    blk_bytes = nb * c_pad * tl * itemsize
    f32_bytes = nb * c_pad * tl * 4
    vmem_limit = int(min(48 << 20,
                         max(16 << 20, 4 * blk_bytes + 2 * f32_bytes + (4 << 20))))
    # TODO(synk): very large C (c_pad*128*itemsize >> budget) needs a two-pass
    # C-split with an accumulator; a single block would not fit v7x's 64 MiB VMEM.

    return pl.pallas_call(
        _spatial_attention_kernel,
        out_shape=jax.ShapeDtypeStruct((n, c, l), x.dtype),
        grid=grid,
        in_specs=[
            pl.BlockSpec(memory_space=pltpu.MemorySpace.SMEM),       # params (3,)
            pl.BlockSpec((nb, c, tl), lambda i, j: (i, 0, j)),       # x tile
        ],
        out_specs=pl.BlockSpec((nb, c, tl), lambda i, j: (i, 0, j)),
        compiler_params=pltpu.CompilerParams(
            dimension_semantics=("parallel", "parallel"),
            vmem_limit_bytes=vmem_limit,
        ),
        cost_estimate=pl.CostEstimate(
            flops=3 * n * c * l,                       # sum + max-compare + final multiply
            transcendentals=n * l,                     # sigmoid per position
            bytes_accessed=2 * n * c * l * itemsize,   # read x once, write out once
        ),
    )(params, x)


def spatial_attention_ref(x, conv_w, conv_b):
    xf = x.astype(jnp.float32)
    avg = jnp.mean(xf, axis=1, keepdims=True)
    mx = jnp.max(xf, axis=1, keepdims=True)
    w = conv_w.reshape(2).astype(jnp.float32)
    logits = w[0] * avg + w[1] * mx + conv_b.reshape(()).astype(jnp.float32)
    return (jax.nn.sigmoid(logits) * xf).astype(x.dtype)


if __name__ == "__main__":
    key = jax.random.PRNGKey(0)
    kx, kw, kb, kx2, kx3 = jax.random.split(key, 5)

    # Conv1d(2, 1, kernel_size=1): weight (1, 2, 1), bias (1,) — deterministic init.
    conv_w = jax.random.normal(kw, (1, 2, 1), dtype=jnp.float32) * 0.5
    conv_b = jax.random.normal(kb, (1,), dtype=jnp.float32) * 0.1

    # Primary small-shape test: (N, C, L) = (2, 4, 128), f32.
    N, C, L = 2, 4, 128
    x = jax.random.normal(kx, (N, C, L), dtype=jnp.float32)
    out = jax.block_until_ready(spatial_attention(x, conv_w, conv_b))
    ref = spatial_attention_ref(x, conv_w, conv_b)
    assert out.shape == (N, C, L)
    assert jnp.allclose(out, ref, atol=1e-5, rtol=1e-5)

    # Ragged-L + bf16 test: exercises the masked partial edge block (no host pad).
    N2, C2, L2 = 2, 6, 200
    x2 = jax.random.normal(kx2, (N2, C2, L2), dtype=jnp.float32).astype(jnp.bfloat16)
    out2 = jax.block_until_ready(spatial_attention(x2, conv_w, conv_b))
    ref2 = spatial_attention_ref(x2, conv_w, conv_b)
    assert out2.shape == (N2, C2, L2)
    assert out2.dtype == jnp.bfloat16
    assert jnp.allclose(out2.astype(jnp.float32), ref2.astype(jnp.float32),
                        atol=2e-2, rtol=2e-2)

    # Larger shape: exercises the multi-step grid / min-steps path.
    N3, C3, L3 = 4, 32, 8192
    x3 = jax.random.normal(kx3, (N3, C3, L3), dtype=jnp.float32)
    out3 = jax.block_until_ready(spatial_attention(x3, conv_w, conv_b))
    ref3 = spatial_attention_ref(x3, conv_w, conv_b)
    assert out3.shape == (N3, C3, L3)
    assert jnp.allclose(out3, ref3, atol=1e-5, rtol=1e-5)

    print("KERNEL_OK")
</pallas_src>

<mosaic_0001>
module attributes {stable_mosaic.version = 11 : i64} {
  func.func @_spatial_attention_kernel(%arg0: i32, %arg1: i32, %arg2: memref<3xf32, #tpu.memory_space<smem>>, %arg3: memref<2x4x128xf32, #tpu.memory_space<vmem>>, %arg4: memref<2x4x128xf32, #tpu.memory_space<vmem>>) attributes {dimension_semantics = [#tpu.dimension_semantics<parallel>, #tpu.dimension_semantics<parallel>], iteration_bounds = array<i64: 1, 1>, scalar_prefetch = 0 : i64, scratch_operands = 0 : i64, tpu.core_type = #tpu.core_type<tc>, window_params = [{transform_indices = @transform_0, window_bounds = array<i64: 3>}, {transform_indices = @transform_1, window_bounds = array<i64: 2, 4, 128>}, {transform_indices = @transform_2, window_bounds = array<i64: 2, 4, 128>}]} {
    %c0 = arith.constant 0 : index
    %c0_0 = arith.constant 0 : index
    %c0_1 = arith.constant 0 : index
    %0 = vector.load %arg3[%c0, %c0_0, %c0_1] : memref<2x4x128xf32, #tpu.memory_space<vmem>>, vector<2x4x128xf32>
    %cst = arith.constant dense<0.000000e+00> : vector<2x128xf32>
    %1 = vector.multi_reduction <add>, %0, %cst [1] : vector<2x4x128xf32> to vector<2x128xf32>
    %2 = vector.shape_cast %1 : vector<2x128xf32> to vector<2x1x128xf32>
    %cst_2 = arith.constant dense<0xFF800000> : vector<2x128xf32>
    %3 = vector.multi_reduction <maximumf>, %0, %cst_2 [1] : vector<2x4x128xf32> to vector<2x128xf32>
    %4 = vector.shape_cast %3 : vector<2x128xf32> to vector<2x1x128xf32>
    %c0_3 = arith.constant 0 : index
    %5 = memref.load %arg2[%c0_3] : memref<3xf32, #tpu.memory_space<smem>>
    %6 = vector.broadcast %5 : f32 to vector<2x1x128xf32>
    %7 = arith.mulf %6, %2 : vector<2x1x128xf32>
    %c1 = arith.constant 1 : index
    %8 = memref.load %arg2[%c1] : memref<3xf32, #tpu.memory_space<smem>>
    %9 = vector.broadcast %8 : f32 to vector<2x1x128xf32>
    %10 = arith.mulf %9, %4 : vector<2x1x128xf32>
    %11 = arith.addf %7, %10 : vector<2x1x128xf32>
    %c2 = arith.constant 2 : index
    %12 = memref.load %arg2[%c2] : memref<3xf32, #tpu.memory_space<smem>>
    %13 = vector.broadcast %12 : f32 to vector<2x1x128xf32>
    %14 = arith.addf %11, %13 : vector<2x1x128xf32>
    %15 = arith.negf %14 : vector<2x1x128xf32>
    %16 = math.exp %15 : vector<2x1x128xf32>
    %cst_4 = arith.constant 1.000000e+00 : f32
    %17 = vector.broadcast %cst_4 : f32 to vector<2x1x128xf32>
    %18 = arith.addf %17, %16 : vector<2x1x128xf32>
    %19 = arith.divf %17, %18 : vector<2x1x128xf32>
    %20 = vector.broadcast %19 : vector<2x1x128xf32> to vector<2x4x128xf32>
    %21 = arith.mulf %0, %20 : vector<2x4x128xf32>
    %c0_5 = arith.constant 0 : index
    %c0_6 = arith.constant 0 : index
    %c0_7 = arith.constant 0 : index
    %22 = vector.load %arg4[%c0_5, %c0_6, %c0_7] : memref<2x4x128xf32, #tpu.memory_space<vmem>>, vector<2x4x128xf32>
    tpu.vector_store %arg4[%c0_5, %c0_6, %c0_7], %21 {strides = array<i32>} : memref<2x4x128xf32, #tpu.memory_space<vmem>>, vector<2x4x128xf32>,
    return
  }
  func.func @transform_0(%arg0: i32, %arg1: i32) -> i32 {
    %c0_i32 = arith.constant 0 : i32
    %c0_i32_0 = arith.constant 0 : i32
    return %c0_i32 : i32
  }
  func.func @transform_1(%arg0: i32, %arg1: i32) -> (i32, i32, i32) {
    %c0_i32 = arith.constant 0 : i32
    %c0_i32_0 = arith.constant 0 : i32
    return %arg0, %c0_i32, %arg1 : i32, i32, i32
  }
  func.func @transform_2(%arg0: i32, %arg1: i32) -> (i32, i32, i32) {
    %c0_i32 = arith.constant 0 : i32
    %c0_i32_0 = arith.constant 0 : i32
    return %arg0, %c0_i32, %arg1 : i32, i32, i32
  }
}

</mosaic_0001>

<bundles_post_ra>
// kernel: tpu_custom_call.1
= control target key start
LH: loop header
LB: loop body
LE: loop exit
PB: predicated region body
PF: predicated region fallthrough
CT: control target
= control target key end

     0   :  { %7 = vsyncpa [#allocation5], 0  ;;  %s261_s0 = inlined_call_operand.hbm [shape: f32[3], index: 0, kind: input, shape index: {}]   ;;  %s262_s1 = inlined_call_operand.hbm [shape: f32[2,4,128], index: 1, kind: input, shape index: {}]   ;;  %s263_s2 = inlined_call_operand.hbm [shape: f32[2,4,128], index: 2, kind: output, shape index: {}]  }
   0x1   :  { %8 = vsyncpa [#allocation3], 0 }
   0x2   :  { %9 = vsyncpa [#allocation4], 0  ;;  %s133_s11 = scalar_lea.hbm %s261_s0, 16 }
   0x3   :  { %p134_p0 = scmp.ne.s32.totalorder %s261_s0, %s133_s11  ;;  %p137_p1 = scmp.lt.u32.totalorder %s133_s11, %s261_s0 }
   0x5   :  { %p139_p2 = pnand %p137_p1, %p134_p0 }
   0x7   :  { %142 = shalt.err (!%p139_p2)
}
   0x8   :  { %s193_s16 = smov [#allocation2]   ;;  %s194_s19 = smov [#allocation6]  }
   0x9   :  { %17 = dma.hbm_to_smem %s261_s0, 16, %s193_s16, [#allocation5]  }
   0xa   :  { %s23_s20 = sshll.u32 %s194_s19, 4  ;;  %s143_s23 = scalar_lea.hbm %s262_s1, 128  ;;  %s24_s20 = int_to_ptr.vmem [resolvable:$true] %s23_s20 }
   0xb   :  { %p144_p3 = scmp.ne.s32.totalorder %s262_s1, %s143_s23  ;;  %p147_p4 = scmp.lt.u32.totalorder %s143_s23, %s262_s1 }
   0xd   :  { %p149_p5 = pnand %p147_p4, %p144_p3 }
   0xf   :  { %152 = shalt.err (!%p149_p5)
}
  0x10   :  { %s153_s28 = scalar_lea.vmem %s24_s20, 128  ;;  %p158_p7 = scmp.lt.s32.totalorder %s24_s20, %s24_s20 }
  0x11   :  { %p154_p6 = scmp.ne.s32.totalorder %s24_s20, %s153_s28  ;;  %p159_p8 = scmp.lt.s32.totalorder %s153_s28, %s153_s28 }
  0x13   :  { %p160_p9 = por %p159_p8, %p158_p7 }
  0x15   :  { %p161_p10 = pnand %p160_p9, %p154_p6 }
  0x17   :  { %164 = shalt.err (!%p161_p10)
}
  0x18   :  { %s195_s0 = smov 64   ;;  %s196_s29 = smov 4  }
  0x19   :  { %29 = dma.hbm_to_vmem [thread:$0]  %s262_s1, 128, %s24_s20, [#allocation3], %s195_s0, %s195_s0, %s196_s29  }
  0x1a   :  { %187 = dma.done.wait [#allocation5], 16  }
  0x1b   :  { %188 = vsyncadd [#allocation5], 4294967280 }
  0x1c   :  { %189 = dma.done.wait [#allocation3], 128  }
  0x1d   :  { %190 = vsyncadd [#allocation3], 4294967168 }
  0x1e   :  { %36 = sfence }
  0x1f   :  { %v37_v0 = vld [vmem:[#allocation6] sm:$0xf]  ;;  %vm39_vm0 = vcmask 1043456   ;;  %v38_v5 = vld [vmem:[#allocation6 + $0x4] sm:$0xf]  ;;  %s240_s4 = sld [smem:[#allocation2]] }
  0x20   :  { %v40_v1 = vsel %vm39_vm0, %v37_v0, 0.0  ;;  %v54_v2 = vsel %vm39_vm0, %v37_v0, -inf  ;;  %s242_s5 = sld [smem:[#allocation2 + $0x1]]  ;;  %v47_v6 = vsel %vm39_vm0, %v38_v5, 0.0  ;;  %v61_v7 = vsel %vm39_vm0, %v38_v5, -inf  ;;  %s117_s1 = sld [smem:[#allocation2 + $0x2]] }
  0x21   :  { %v41_v3 = vrot.slane %v40_v1, 4  ;;  %v55_v4 = vrot.slane %v54_v2, 4  ;;  %v48_v10 = vrot.slane %v47_v6, 4  ;;  %v62_v11 = vrot.slane %v61_v7, 4  ;;  %s197_s6 = smov [#allocation7]  }
  0x22   :  { %s103_s7 = sshll.u32 %s197_s6, 4  ;;  %s104_s7 = int_to_ptr.vmem [resolvable:$true] %s103_s7 }
  0x23   :  { %v42_v8 = vadd.f32 %v41_v3, %v40_v1  ;;  %v56_v9 = vmax.f32 %v54_v2, %v55_v4  ;;  %v49_v14 = vadd.f32 %v48_v10, %v47_v6  ;;  %v63_v15 = vmax.f32 %v61_v7, %v62_v11  ;;  %s165_s8 = scalar_lea.vmem %s104_s7, 128  ;;  %p170_p12 = scmp.lt.s32.totalorder %s104_s7, %s104_s7 }
  0x24   :  { %p166_p11 = scmp.ne.s32.totalorder %s104_s7, %s165_s8  ;;  %p171_p13 = scmp.lt.s32.totalorder %s165_s8, %s165_s8 }
  0x25   :  { %v43_v12 = vrot.slane %v42_v8, 2  ;;  %v57_v13 = vrot.slane %v56_v9, 2  ;;  %v50_v18 = vrot.slane %v49_v14, 2  ;;  %v64_v19 = vrot.slane %v63_v15, 2 }
  0x26   :  { %v69_v23 = vstv %s240_s4  ;;  %v73_v24 = vstv %s242_s5  ;;  %v79_v33 = vstv %s117_s1  ;;  %p172_p0 = por %p171_p13, %p170_p12 }
  0x27   :  { %v44_v16 = vadd.f32 %v43_v12, %v42_v8  ;;  %v58_v17 = vmax.f32 %v56_v9, %v57_v13  ;;  %v51_v22 = vadd.f32 %v50_v18, %v49_v14  ;;  %v65_v25 = vmax.f32 %v63_v15, %v64_v19 }
  0x28   :  { %p173_p1 = pnand %p172_p0, %p166_p11 }
  0x29   :  { %v45_v20 = vrot.slane %v44_v16, 1  ;;  %v59_v21 = vrot.slane %v58_v17, 1  ;;  %v52_v28 = vrot.slane %v51_v22, 1  ;;  %v66_v29 = vrot.slane %v65_v25, 1 }
  0x2b   :  { %v46_v26 = vadd.f32 %v45_v20, %v44_v16  ;;  %v60_v27 = vmax.f32 %v58_v17, %v59_v21  ;;  %v53_v32 = vadd.f32 %v52_v28, %v51_v22  ;;  %v67_v34 = vmax.f32 %v65_v25, %v66_v29 }
  0x2d   :  { %v70_v30 = vmul.f32 %v69_v23, %v46_v26  ;;  %v74_v31 = vmul.f32 %v73_v24, %v60_v27  ;;  %v71_v36 = vmul.f32 %v69_v23, %v53_v32  ;;  %v75_v37 = vmul.f32 %v73_v24, %v67_v34 }
  0x2f   :  { %v76_v35 = vadd.f32 %v74_v31, %v70_v30  ;;  %v77_v39 = vadd.f32 %v75_v37, %v71_v36 }
  0x31   :  { %v80_v38 = vadd.f32 %v79_v33, %v76_v35  ;;  %v81_v41 = vadd.f32 %v79_v33, %v77_v39 }
  0x33   :  { %v118_v40 = vmul.f32 -1.442695, %v80_v38  ;;  %v119_v42 = vmul.f32 -1.442695, %v81_v41 }
  0x35   :  { %125 = vpow2.f32 %v118_v40 }
  0x36   :  { %127 = vpow2.f32 %v119_v42 }
  0x3f   :  { %v126_v43 = vpop.eup %125 }
  0x40   :  { %v88_v44 = vadd.f32 1.0, %v126_v43  ;;  %v128_v45 = vpop.eup %127 }
  0x41   :  { %v89_v46 = vadd.f32 1.0, %v128_v45 }
  0x42   :  { %129 = vrcp.f32 %v88_v44 }
  0x43   :  { %131 = vrcp.f32 %v89_v46 }
  0x4c   :  { %v130_v47 = vpop.eup %129 }
  0x4d   :  { %v94_v48 = vmul.f32 %v130_v47, %v37_v0  ;;  %v132_v49 = vpop.eup %131 }
  0x4e   :  { %v95_v50 = vmul.f32 %v132_v49, %v38_v5 }
  0x4f   :  { %96 = vst [vmem:[#allocation7] sm:$0xf] %v94_v48 }
  0x50   :  { %97 = vst [vmem:[#allocation7 + $0x4] sm:$0xf] %v95_v50 }
  0x51   :  { %176 = shalt.err (!%p173_p1)
}
  0x52   :  { %s177_s11 = scalar_lea.hbm %s263_s2, 128 }
  0x53   :  { %p178_p2 = scmp.ne.s32.totalorder %s263_s2, %s177_s11  ;;  %p181_p3 = scmp.lt.u32.totalorder %s177_s11, %s263_s2 }
  0x55   :  { %p183_p4 = pnand %p181_p3, %p178_p2 }
  0x57   :  { %186 = shalt.err (!%p183_p4)
}
  0x58   :  { %109 = dma.vmem_to_hbm [thread:$0]  %s104_s7, 128, %s263_s2, [#allocation4], %s195_s0, %s195_s0, %s196_s29  }
  0x59   :  { %191 = dma.done.wait [#allocation4], 128  }
  0x5a   :  { %192 = vsyncadd [#allocation4], 4294967168 }
  0x5b   :  { %113 = vsyncpa [#allocation3], 1 }
  0x5c   :  { %114 = vsyncpa [#allocation4], 1 }
  0x5d   :  { %115 = vsyncpa [#allocation5], 1 }

</bundles_post_ra>
